<compile_context>
chip_gen: v7x
topology: tpu7x:2x2x1
jax: 0.10.0
libtpu: 0.0.40
codegen_flags: <defaults>
</compile_context>

<pallas_src>
import functools
import math

import jax
import jax.numpy as jnp
from jax.experimental import pallas as pl
from jax.experimental.pallas import tpu as pltpu


def _round_up(n, m):
    return ((n + m - 1) // m) * m


# --------------------------------------------------------------------------- #
# Kernel
# --------------------------------------------------------------------------- #
def _mlp_kernel(num_layers, out_dims_p, x_ref, *refs):
    """refs = (W_0, ..., W_{L-1}, bias_packed, out_ref).

    W_l          : [dims_p[l], dims_p[l+1]]  bf16 (BN folded, zero-padded)
    bias_packed  : [L, max_dim_p]            f32  (folded bias, zero-padded)
    """
    out_ref = refs[-1]
    w_refs = refs[:num_layers]
    b_ref = refs[num_layers]

    h = x_ref[...]                                    # bf16 (tile_b, dims_p[0])
    for l in range(num_layers):
        dp = out_dims_p[l]
        # Linear on the MXU with f32 accumulation.
        acc = jnp.dot(h, w_refs[l][...], preferred_element_type=jnp.float32)
        # f32 epilogue: folded-BN bias add (+ ReLU for hidden layers).
        acc = acc + b_ref[pl.ds(l, 1), :dp]           # (1, dp) broadcast row
        if l < num_layers - 1:
            acc = jnp.maximum(acc, 0.0)
            h = acc.astype(jnp.bfloat16)              # bf16 for the next dot
        else:
            out_ref[...] = acc.astype(out_ref.dtype)


# --------------------------------------------------------------------------- #
# Parameter preparation (fold BN, transpose, zero-pad, cast, pack biases)
# --------------------------------------------------------------------------- #
def prepare_params(layers, size_list, eps=1e-5):
    num_layers = len(layers)
    dims_p = [_round_up(d, 128) for d in size_list]

    weights, biases = [], []
    for i, layer in enumerate(layers):
        w = layer["w"].T.astype(jnp.float32)          # torch [out,in] -> [in,out]
        b = layer["b"].astype(jnp.float32)
        if "gamma" in layer:                          # hidden layer: fold eval BN
            scale = layer["gamma"] / jnp.sqrt(layer["var"] + eps)
            shift = layer["beta"] - layer["mean"] * scale
            w = w * scale[None, :]
            b = b * scale + shift
        wp = jnp.zeros((dims_p[i], dims_p[i + 1]), jnp.float32)
        wp = wp.at[: w.shape[0], : w.shape[1]].set(w)
        weights.append(wp.astype(jnp.bfloat16))       # bf16 MXU operands
        biases.append(b)

    max_d = max(dims_p[1:])
    bias_packed = jnp.zeros((num_layers, max_d), jnp.float32)
    for i, b in enumerate(biases):
        bias_packed = bias_packed.at[i, : b.shape[0]].set(b)

    return weights, bias_packed, dims_p


# --------------------------------------------------------------------------- #
# Wrapper
# --------------------------------------------------------------------------- #
def my_mlp_forward(x, layers, size_list, *, tile_b=512, eps=1e-5):
    """x: [B, size_list[0]] float32.  layers: PyTorch-convention params (eval)."""
    weights, bias_packed, dims_p = prepare_params(layers, size_list, eps)
    num_layers = len(weights)

    B = x.shape[0]
    din_p, dout_p = dims_p[0], dims_p[-1]
    max_dim_p = max(dims_p)

    # ---- Batch tile driven by B (bf16 activations -> sublane multiple of 16).
    max_tile = _round_up(max(tile_b, 16), 16)
    B16 = _round_up(B, 16)
    if B16 <= max_tile:
        # <=2 tiles: both v7x TensorCores get real rows; ~no padded-row waste.
        n_tiles = 2 if B16 >= 32 else 1
        tile = _round_up(-(-B // n_tiles), 16)
    else:
        tile = max_tile
    Bp = _round_up(B, tile)

    xp = jnp.zeros((Bp, din_p), jnp.bfloat16)
    xp = xp.at[:B, : size_list[0]].set(x.astype(jnp.bfloat16))

    grid = (Bp // tile,)

    # ---- BlockSpecs: batch-tiled x/out, single-buffered grid-invariant weights.
    in_specs = [pl.BlockSpec((tile, din_p), lambda i: (i, 0))]
    for w in weights:
        in_specs.append(
            pl.BlockSpec(w.shape, lambda i, nd=w.ndim: (0,) * nd,
                         pipeline_mode=pl.Buffered(1))
        )
    in_specs.append(
        pl.BlockSpec(bias_packed.shape,
                     lambda i, nd=bias_packed.ndim: (0,) * nd,
                     pipeline_mode=pl.Buffered(1))
    )
    out_spec = pl.BlockSpec((tile, dout_p), lambda i: (i, 0))

    # ---- VMEM budget: 2x(x,out tiles) + 1x(weights+bias) + activation slack.
    weight_bytes = sum(int(w.size) * 2 for w in weights) + int(bias_packed.size) * 4
    io_bytes = 2 * (tile * din_p * 2 + tile * dout_p * 4)
    act_bytes = 2 * tile * max_dim_p * 4
    vmem_limit = min(56 << 20, weight_bytes + io_bytes + act_bytes + (16 << 20))

    flops = 2 * Bp * sum(dims_p[i] * dims_p[i + 1] for i in range(num_layers))
    bytes_accessed = (
        2 * Bp * din_p                       # bf16 input
        + 4 * Bp * dout_p                    # f32 output
        + sum(int(w.size) * 2 for w in weights)
        + int(bias_packed.size) * 4
    )

    kernel = functools.partial(_mlp_kernel, num_layers, tuple(dims_p[1:]))

    out_padded = pl.pallas_call(
        kernel,
        out_shape=jax.ShapeDtypeStruct((Bp, dout_p), jnp.float32),
        grid_spec=pltpu.PrefetchScalarGridSpec(
            num_scalar_prefetch=0,
            grid=grid,
            in_specs=in_specs,
            out_specs=out_spec,
        ),
        compiler_params=pltpu.CompilerParams(
            dimension_semantics=("parallel",),
            vmem_limit_bytes=vmem_limit,
        ),
        cost_estimate=pl.CostEstimate(
            flops=flops, transcendentals=0, bytes_accessed=bytes_accessed
        ),
    )(xp, *weights, bias_packed)

    return out_padded[:B, : size_list[-1]]


# --------------------------------------------------------------------------- #
# Synthetic parameters (PyTorch-convention shapes) and reference forward
# --------------------------------------------------------------------------- #
def init_params(key, size_list):
    """Deterministic params matching My_MLP(size_list) in eval mode."""
    num_hidden = len(size_list) - 2
    layers = []
    for i in range(num_hidden + 1):
        fan_in, fan_out = size_list[i], size_list[i + 1]
        key, kw, kb = jax.random.split(key, 3)
        bound = 1.0 / math.sqrt(fan_in)
        layer = {
            "w": jax.random.uniform(kw, (fan_out, fan_in), jnp.float32, -bound, bound),
            "b": jax.random.uniform(kb, (fan_out,), jnp.float32, -bound, bound),
        }
        if i < num_hidden:
            key, kg, kbt, km, kv = jax.random.split(key, 5)
            layer["gamma"] = jax.random.uniform(kg, (fan_out,), jnp.float32, 0.5, 1.5)
            layer["beta"] = jax.random.uniform(kbt, (fan_out,), jnp.float32, -0.5, 0.5)
            layer["mean"] = jax.random.uniform(km, (fan_out,), jnp.float32, -0.5, 0.5)
            layer["var"] = jax.random.uniform(kv, (fan_out,), jnp.float32, 0.5, 1.5)
        layers.append(layer)
    return layers


def reference_forward(x, layers, size_list, eps=1e-5):
    num_hidden = len(size_list) - 2
    h = x
    for i, layer in enumerate(layers):
        h = h @ layer["w"].T + layer["b"]
        if i < num_hidden:
            h = (h - layer["mean"]) / jnp.sqrt(layer["var"] + eps)
            h = h * layer["gamma"] + layer["beta"]
            h = jnp.maximum(h, 0.0)
    return h


# --------------------------------------------------------------------------- #
if __name__ == "__main__":
    # Phoneme-recognition-ish shapes: 40 input features, 71 phoneme classes.
    size_list = [40, 128, 128, 71]
    batch = 300  # deliberately not a multiple of the batch tile

    key = jax.random.PRNGKey(0)
    key, kx = jax.random.split(key)
    x = jax.random.normal(kx, (batch, size_list[0]), jnp.float32)

    layers = init_params(key, size_list)

    out = my_mlp_forward(x, layers, size_list)
    out = jax.block_until_ready(out)

    ref = reference_forward(x, layers, size_list)
    assert out.shape == (batch, size_list[-1])

    # bf16 operands -> tolerance normalized against output magnitude.
    err = float(jnp.max(jnp.abs(out - ref)))
    scale = float(jnp.max(jnp.abs(ref))) + 1e-6
    assert err / scale < 3e-2, (err, scale)

    print("KERNEL_OK")
</pallas_src>

<mosaic_0001>
module attributes {stable_mosaic.version = 11 : i64} {
  func.func @_mlp_kernel(%arg0: i32, %arg1: memref<160x128xbf16, #tpu.memory_space<vmem>>, %arg2: memref<128x128xbf16, #tpu.memory_space<vmem>>, %arg3: memref<128x128xbf16, #tpu.memory_space<vmem>>, %arg4: memref<128x128xbf16, #tpu.memory_space<vmem>>, %arg5: memref<3x128xf32, #tpu.memory_space<vmem>>, %arg6: memref<160x128xf32, #tpu.memory_space<vmem>>) attributes {dimension_semantics = [#tpu.dimension_semantics<parallel>], iteration_bounds = array<i64: 2>, scalar_prefetch = 0 : i64, scratch_operands = 0 : i64, tpu.core_type = #tpu.core_type<tc>, window_params = [{transform_indices = @transform_0, window_bounds = array<i64: 160, 128>}, {pipeline_mode = #tpu.pipeline_mode<synchronous>, transform_indices = @transform_1, window_bounds = array<i64: 128, 128>}, {pipeline_mode = #tpu.pipeline_mode<synchronous>, transform_indices = @transform_2, window_bounds = array<i64: 128, 128>}, {pipeline_mode = #tpu.pipeline_mode<synchronous>, transform_indices = @transform_3, window_bounds = array<i64: 128, 128>}, {pipeline_mode = #tpu.pipeline_mode<synchronous>, transform_indices = @transform_4, window_bounds = array<i64: 3, 128>}, {transform_indices = @transform_5, window_bounds = array<i64: 160, 128>}]} {
    %c0 = arith.constant 0 : index
    %c0_0 = arith.constant 0 : index
    %0 = vector.load %arg1[%c0, %c0_0] : memref<160x128xbf16, #tpu.memory_space<vmem>>, vector<160x128xbf16>
    %c0_1 = arith.constant 0 : index
    %c0_2 = arith.constant 0 : index
    %1 = vector.load %arg2[%c0_1, %c0_2] : memref<128x128xbf16, #tpu.memory_space<vmem>>, vector<128x128xbf16>
    %cst = arith.constant dense<0.000000e+00> : vector<160x128xf32>
    %2 = tpu.matmul %0, %1, %cst {dimension_numbers = #tpu.dot_dimension_numbers<[1], [0], [0], [1], [0, 0, 1, 1], [], []>} : vector<160x128xbf16>, vector<128x128xbf16>, vector<160x128xf32> -> vector<160x128xf32>
    %c0_3 = arith.constant 0 : index
    %c0_4 = arith.constant 0 : index
    %3 = vector.load %arg5[%c0_3, %c0_4] : memref<3x128xf32, #tpu.memory_space<vmem>>, vector<1x128xf32>
    %4 = vector.broadcast %3 : vector<1x128xf32> to vector<160x128xf32>
    %5 = arith.addf %2, %4 : vector<160x128xf32>
    %cst_5 = arith.constant 0.000000e+00 : f32
    %6 = vector.broadcast %cst_5 : f32 to vector<160x128xf32>
    %7 = arith.maximumf %5, %6 : vector<160x128xf32>
    %8 = arith.truncf %7 : vector<160x128xf32> to vector<160x128xbf16>
    %c0_6 = arith.constant 0 : index
    %c0_7 = arith.constant 0 : index
    %9 = vector.load %arg3[%c0_6, %c0_7] : memref<128x128xbf16, #tpu.memory_space<vmem>>, vector<128x128xbf16>
    %cst_8 = arith.constant dense<0.000000e+00> : vector<160x128xf32>
    %10 = tpu.matmul %8, %9, %cst_8 {dimension_numbers = #tpu.dot_dimension_numbers<[1], [0], [0], [1], [0, 0, 1, 1], [], []>} : vector<160x128xbf16>, vector<128x128xbf16>, vector<160x128xf32> -> vector<160x128xf32>
    %c1 = arith.constant 1 : index
    %c0_9 = arith.constant 0 : index
    %11 = vector.load %arg5[%c1, %c0_9] : memref<3x128xf32, #tpu.memory_space<vmem>>, vector<1x128xf32>
    %12 = vector.broadcast %11 : vector<1x128xf32> to vector<160x128xf32>
    %13 = arith.addf %10, %12 : vector<160x128xf32>
    %cst_10 = arith.constant 0.000000e+00 : f32
    %14 = vector.broadcast %cst_10 : f32 to vector<160x128xf32>
    %15 = arith.maximumf %13, %14 : vector<160x128xf32>
    %16 = arith.truncf %15 : vector<160x128xf32> to vector<160x128xbf16>
    %c0_11 = arith.constant 0 : index
    %c0_12 = arith.constant 0 : index
    %17 = vector.load %arg4[%c0_11, %c0_12] : memref<128x128xbf16, #tpu.memory_space<vmem>>, vector<128x128xbf16>
    %cst_13 = arith.constant dense<0.000000e+00> : vector<160x128xf32>
    %18 = tpu.matmul %16, %17, %cst_13 {dimension_numbers = #tpu.dot_dimension_numbers<[1], [0], [0], [1], [0, 0, 1, 1], [], []>} : vector<160x128xbf16>, vector<128x128xbf16>, vector<160x128xf32> -> vector<160x128xf32>
    %c2 = arith.constant 2 : index
    %c0_14 = arith.constant 0 : index
    %19 = vector.load %arg5[%c2, %c0_14] : memref<3x128xf32, #tpu.memory_space<vmem>>, vector<1x128xf32>
    %20 = vector.broadcast %19 : vector<1x128xf32> to vector<160x128xf32>
    %21 = arith.addf %18, %20 : vector<160x128xf32>
    %c0_15 = arith.constant 0 : index
    %c0_16 = arith.constant 0 : index
    %22 = vector.load %arg6[%c0_15, %c0_16] : memref<160x128xf32, #tpu.memory_space<vmem>>, vector<160x128xf32>
    tpu.vector_store %arg6[%c0_15, %c0_16], %21 {strides = array<i32>} : memref<160x128xf32, #tpu.memory_space<vmem>>, vector<160x128xf32>,
    return
  }
  func.func @transform_0(%arg0: i32) -> (i32, i32) {
    %c0_i32 = arith.constant 0 : i32
    %c0_i32_0 = arith.constant 0 : i32
    return %arg0, %c0_i32 : i32, i32
  }
  func.func @transform_1(%arg0: i32) -> (i32, i32) {
    %c0_i32 = arith.constant 0 : i32
    %c0_i32_0 = arith.constant 0 : i32
    %c0_i32_1 = arith.constant 0 : i32
    return %c0_i32, %c0_i32_0 : i32, i32
  }
  func.func @transform_2(%arg0: i32) -> (i32, i32) {
    %c0_i32 = arith.constant 0 : i32
    %c0_i32_0 = arith.constant 0 : i32
    %c0_i32_1 = arith.constant 0 : i32
    return %c0_i32, %c0_i32_0 : i32, i32
  }
  func.func @transform_3(%arg0: i32) -> (i32, i32) {
    %c0_i32 = arith.constant 0 : i32
    %c0_i32_0 = arith.constant 0 : i32
    %c0_i32_1 = arith.constant 0 : i32
    return %c0_i32, %c0_i32_0 : i32, i32
  }
  func.func @transform_4(%arg0: i32) -> (i32, i32) {
    %c0_i32 = arith.constant 0 : i32
    %c0_i32_0 = arith.constant 0 : i32
    %c0_i32_1 = arith.constant 0 : i32
    return %c0_i32, %c0_i32_0 : i32, i32
  }
  func.func @transform_5(%arg0: i32) -> (i32, i32) {
    %c0_i32 = arith.constant 0 : i32
    %c0_i32_0 = arith.constant 0 : i32
    return %arg0, %c0_i32 : i32, i32
  }
}

</mosaic_0001>

<bundles_post_ra>
// kernel: tpu_custom_call.1
= control target key start
LH: loop header
LB: loop body
LE: loop exit
PB: predicated region body
PF: predicated region fallthrough
CT: control target
= control target key end

     0   :  { %10 = vsyncpa [#allocation3], 0  ;;  %s2090_s0 = inlined_call_operand.hbm [shape: bf16[320,128], index: 0, kind: input, shape index: {}]   ;;  %s2091_s1 = inlined_call_operand.hbm [shape: bf16[128,128], index: 1, kind: input, shape index: {}]   ;;  %s2092_s2 = inlined_call_operand.hbm [shape: bf16[128,128], index: 2, kind: input, shape index: {}]   ;;  %s2093_s3 = inlined_call_operand.hbm [shape: bf16[128,128], index: 3, kind: input, shape index: {}]   ;;  %s2094_s4 = inlined_call_operand.vmem [shape: f32[3,128], index: 4, kind: input, shape index: {}]   ;;  %s2095_s5 = inlined_call_operand.hbm [shape: f32[320,128], index: 5, kind: output, shape index: {}]  }
   0x1   :  { %12 = vsyncpa [#allocation3 + $0x1], 0 }
   0x2   :  { %13 = vsyncpa [#allocation6], 0 }
   0x3   :  { %14 = vsyncpa [#allocation9], 0 }
   0x4   :  { %15 = vsyncpa [#allocation4], 0 }
   0x5   :  { %17 = vsyncpa [#allocation4 + $0x1], 0  ;;  %s1690_s18 = smov 0   ;;  %s1692_s19 = smov 0  }
   0x6   :  { %s1694_s20 = smov 0   ;;  %s1696_s21 = smov 0  }
   0x7 LB: > { %s1711_s22 = sadd.s32 4294967295, %s1649_s21   ;;  %s1112_s23 = sadd.s32 4294967294, %s1649_s21   ;;  %s1649_s21 = sphi %s1696_s21, %s2120_s21   ;;  %s1645_s20 = sphi %s1694_s20, %s2119_s20   ;;  %s1641_s19 = sphi %s1692_s19, %s2118_s19   ;;  %s1637_s18 = sphi %s1690_s18, %s2117_s18  }
   0x8   : > { %p43_p0 = scmp.ne.s32.totalorder %s1641_s19, %s1637_s18  ;;  %p2096_p1 = scmp.eq.s32.totalorder %s1711_s22, 0 }
   0x9   : > { %p157_p3 = scmp.eq.s32.totalorder %s1112_s23, 1  ;;  %p1113_p5 = scmp.ge.s32.totalorder %s1649_s21, 1 }
   0xa   : > { %p1720_p4 = por %p2096_p1, %p43_p0  ;;  %p164_p7 = scmp.lt.s32.totalorder %s1649_s21, 3 }
   0xb   : > { %p1725_p6 = por %p157_p3, %p43_p0  ;;  %s1651_s27 = smov [#allocation5]  }
   0xc   : > { %s2100_s24 = scalar_select %p1720_p4, 1, 0 }
   0xd   : > { %s2101_s25 = scalar_select %p1725_p6, 1, 0 }
   0xe   : > { %p1730_p8 = pnand %p1113_p5, %p164_p7  ;;  %s176_s28 = sshll.u32 %s1651_s27, 4  ;;  %s1734_s28 = int_to_ptr.vmem [resolvable:$true] %s176_s28 }
   0xf   : > { %s1652_s30 = smov [#allocation7]   ;;  %s1653_s7 = smov [#allocation8]  }
  0x10   : > { %s2102_s26 = scalar_select %p1730_p8, 1, 0 }
  0x11   : > { %p1362_p9 = pneg %p1730_p8  ;;  %s189_s6 = sshll.u32 %s1652_s30, 4  ;;  %s1745_s6 = int_to_ptr.vmem [resolvable:$true] %s189_s6 }
  0x12   : > { %s1747_s8 = sshll.u32 %s1653_s7, 4  ;;  %s1461_s11 = scalar_lea.hbm %s2091_s1, 1024  ;;  %s203_s8 = int_to_ptr.vmem [resolvable:$true] %s1747_s8 }
  0x13   : > { %p1741_p11 = pnand %p1362_p9, %p2096_p1  ;;  %p1462_p12 = scmp.ne.s32.totalorder %s2091_s1, %s1461_s11 }
  0x14   : > { %p1468_p5 = scmp.lt.u32.totalorder %s1461_s11, %s2091_s1 }
  0x15   : > { %p1757_p13 = pneg %p1741_p11 }
  0x17   : > { %p1464_p0 = pnand %p1757_p13, %p1462_p12 }
  0x19   : > { %p1465_p3 = pneg %p1464_p0 }
  0x1b   : > { %p1470_p7 = pnand %p1468_p5, %p1465_p3 }
  0x1d   : > { %1473 = shalt.err (!%p1470_p7)
}
  0x1e   : > { %s1474_s17 = scalar_lea.vmem %s1734_s28, 1024  ;;  %p1482_p2 = scmp.lt.s32.totalorder %s1734_s28, %s1734_s28 }
  0x1f   : > { %p1475_p9 = scmp.ne.s32.totalorder %s1734_s28, %s1474_s17  ;;  %p1483_p6 = scmp.lt.s32.totalorder %s1474_s17, %s1474_s17 }
  0x21   : > { %p1477_p10 = pnand %p1475_p9, %p1757_p13  ;;  %p1484_p12 = por %p1483_p6, %p1482_p2 }
  0x23   : > { %p1478_p1 = pneg %p1477_p10 }
  0x25   : > { %p1485_p0 = pnand %p1484_p12, %p1478_p1 }
  0x27   : > { %1488 = shalt.err (!%p1485_p0)
}
  0x28   : > { %s2099_s23 = smov 64   ;;  %s1655_s27 = smov 4  }
  0x29   : > { %1365 = dma.hbm_to_vmem [thread:$0]  (!%p1741_p11), %s2091_s1, 1024, %s1734_s28, [#allocation6], %s2099_s23, %s2099_s23, %s1655_s27  }
  0x2a   : > { %s1489_s11 = scalar_lea.hbm %s2092_s2, 1024 }
  0x2b   : > { %p1490_p1 = scmp.ne.s32.totalorder %s2092_s2, %s1489_s11  ;;  %p1496_p10 = scmp.lt.u32.totalorder %s1489_s11, %s2092_s2 }
  0x2d   : > { %p1492_p2 = pnand %p1490_p1, %p1757_p13 }
  0x2f   : > { %p1493_p6 = pneg %p1492_p2 }
  0x31   : > { %p1498_p3 = pnand %p1496_p10, %p1493_p6 }
  0x33   : > { %1501 = shalt.err (!%p1498_p3)
}
  0x34   : > { %s1502_s28 = scalar_lea.vmem %s1745_s6, 1024  ;;  %p1510_p12 = scmp.lt.s32.totalorder %s1745_s6, %s1745_s6 }
  0x35   : > { %p1503_p5 = scmp.ne.s32.totalorder %s1745_s6, %s1502_s28  ;;  %p1511_p0 = scmp.lt.s32.totalorder %s1502_s28, %s1502_s28 }
  0x37   : > { %p1505_p7 = pnand %p1503_p5, %p1757_p13  ;;  %p1512_p1 = por %p1511_p0, %p1510_p12 }
  0x39   : > { %p1506_p9 = pneg %p1505_p7 }
  0x3b   : > { %p1513_p2 = pnand %p1512_p1, %p1506_p9 }
  0x3d   : > { %1516 = shalt.err (!%p1513_p2)
}
  0x3e   : > { %1368 = dma.hbm_to_vmem [thread:$0]  (!%p1741_p11), %s2092_s2, 1024, %s1745_s6, [#allocation6], %s2099_s23, %s2099_s23, %s1655_s27  }
  0x3f   : > { %s1517_s10 = scalar_lea.hbm %s2093_s3, 1024 }
  0x40   : > { %p1518_p6 = scmp.ne.s32.totalorder %s2093_s3, %s1517_s10  ;;  %p1524_p5 = scmp.lt.u32.totalorder %s1517_s10, %s2093_s3 }
  0x42   : > { %p1520_p10 = pnand %p1518_p6, %p1757_p13 }
  0x44   : > { %p1521_p3 = pneg %p1520_p10 }
  0x46   : > { %p1526_p7 = pnand %p1524_p5, %p1521_p3 }
  0x48   : > { %1529 = shalt.err (!%p1526_p7)
}
  0x49   : > { %s1530_s16 = scalar_lea.vmem %s203_s8, 1024  ;;  %p1538_p1 = scmp.lt.s32.totalorder %s203_s8, %s203_s8 }
  0x4a   : > { %p1531_p9 = scmp.ne.s32.totalorder %s203_s8, %s1530_s16  ;;  %p1539_p2 = scmp.lt.s32.totalorder %s1530_s16, %s1530_s16 }
  0x4c   : > { %p1533_p12 = pnand %p1531_p9, %p1757_p13  ;;  %p1540_p4 = por %p1539_p2, %p1538_p1 }
  0x4e   : > { %p1534_p0 = pneg %p1533_p12 }
  0x50   : > { %p1541_p8 = pnand %p1540_p4, %p1534_p0 }
  0x52   : > { %1544 = shalt.err (!%p1541_p8)
}
  0x53   : > { %1371 = dma.hbm_to_vmem [thread:$0]  (!%p1741_p11), %s2093_s3, 1024, %s203_s8, [#allocation9], %s2099_s23, %s2099_s23, %s1655_s27  }
  0x54   : > { %s1830_s14 = sadd.s32 1, %s1649_s21   ;;  %s30_s17 = sadd.s32 1, %s1645_s20 }
  0x55   : > { %s27_s29 = ssub.s32 %s1649_s21, %s1830_s14  ;;  %p37_p8 = scmp.ne.s32.totalorder %s1645_s20, %s1641_s19 }
  0x56   : > { %p28_p4 = scmp.eq.s32.totalorder %s27_s29, 0  ;;  %p38_p13 = scmp.eq.s32.totalorder %s1649_s21, 0 }
  0x57   : > { %p1383_p6 = scmp.lt.s32.totalorder %s1649_s21, 2  ;;  %p2105_p3 = scmp.eq.s32.totalorder %s1711_s22, 1 }
  0x58   : > { %s1840_s30 = scalar_select %p28_p4, %s1645_s20, %s30_s17  }
  0x59   : > { %p39_p10 = por %p38_p13, %p37_p8  ;;  %p1844_p5 = por %p2105_p3, %p37_p8 }
  0x5a   : > { %s219_s9 = sand.u32 1, %s1645_s20   ;;  %s1163_s10 = smul.u32 1280, %s1649_s21 }
  0x5b   : > { %s1343_s8 = smul.u32 80, %s219_s9  ;;  %p1850_p11 = pnand %p1383_p6, %p39_p10 }
  0x5c   : > { %s1857_s15 = scalar_lea.hbm %s2090_s0, %s1163_s10  ;;  %s1861_s28 = scalar_lea.sflag [#allocation3], %s219_s9 }
  0x5d   : > { %s223_s16 = scalar_lea.vmem [#allocation2], %s1343_s8  ;;  %s1545_s29 = scalar_lea.hbm %s1857_s15, 1280 }
  0x5e   : > { %s230_s6 = sshll.u32 %s223_s16, 4  ;;  %p1546_p7 = scmp.ne.s32.totalorder %s1857_s15, %s1545_s29  ;;  %s1859_s6 = int_to_ptr.vmem [resolvable:$true] %s230_s6 }
  0x5f   : > { %p1547_p9 = pneg %p1850_p11  ;;  %s1550_s12 = scalar_lea.hbm %s2090_s0, 2560 }
  0x60   : > { %p1551_p1 = scmp.lt.u32.totalorder %s1857_s15, %s2090_s0  ;;  %p1552_p2 = scmp.lt.u32.totalorder %s1550_s12, %s1545_s29 }
  0x61   : > { %p1548_p12 = pnand %p1547_p9, %p1546_p7  ;;  %p1554_p8 = scmp.lt.u32.totalorder %s1545_s29, %s1857_s15 }
  0x62   : > { %p1553_p4 = por %p1552_p2, %p1551_p1 }
  0x63   : > { %p1549_p0 = pneg %p1548_p12 }
  0x64   : > { %p1555_p13 = por %p1554_p8, %p1553_p4 }
  0x66   : > { %p1556_p6 = pnand %p1555_p13, %p1549_p0 }
  0x68   : > { %1559 = shalt.err (!%p1556_p6)
}
  0x69   : > { %s1560_s9 = scalar_lea.vmem %s1859_s6, 1280  ;;  %s1656_s8 = smov [#allocation2]  }
  0x6a   : > { %p1561_p10 = scmp.ne.s32.totalorder %s1859_s6, %s1560_s9  ;;  %s1565_s16 = sshll.u32 %s1656_s8, 4  ;;  %s1566_s16 = int_to_ptr.vmem [resolvable:$false] %s1565_s16 }
  0x6b   : > { %s1567_s23 = scalar_lea.vmem %s1566_s16, 2560  ;;  %p1568_p12 = scmp.lt.s32.totalorder %s1859_s6, %s1566_s16 }
  0x6c   : > { %p1563_p3 = pnand %p1561_p10, %p1547_p9  ;;  %p1569_p1 = scmp.lt.s32.totalorder %s1567_s23, %s1560_s9 }
  0x6e   : > { %p1564_p7 = pneg %p1563_p3  ;;  %p1570_p2 = por %p1569_p1, %p1568_p12 }
  0x70   : > { %p1571_p4 = pnand %p1570_p2, %p1564_p7 }
  0x72   : > { %1574 = shalt.err (!%p1571_p4)
}
  0x73   : > { %s2108_s29 = smov 64   ;;  %p2109_p9 = scmp.ne.s32.totalorder %s2102_s26, 0 }
  0x74   : > { %1375 = dma.hbm_to_vmem [thread:$0]  (!%p1850_p11), %s1857_s15, 1280, %s1859_s6, %s1861_s28, %s2108_s29, %s2108_s29, %s1655_s27  }
  0x75   : > { %242 = sbr.rel (%p2109_p9) target bundleno = 873 (0x369), region = 40  ;;  %s1895_s17 = sand.u32 (!%p2109_p9), 1, %s1641_s19  }
  0x76   : > { %s1344_s10 = smul.u32 (!%p2109_p9), 80, %s1895_s17  ;;  %s245_s12 = scalar_lea.sflag (!%p2109_p9), [#allocation3], %s1895_s17 }
  0x77   : > { %p2110_p0 = scmp.ne.s32.totalorder (!%p2109_p9), %s2100_s24, 0 }
  0x78   : > { %s1899_s13 = scalar_lea.vmem (!%p2109_p9), [#allocation2], %s1344_s10 }
  0x7c   : > { %1620 = dma.done.wait (%p2110_p0), %s245_s12, 1280  }
  0x7d   : > { %1622 = vsyncadd (%p2110_p0), %s245_s12, 4294966016  ;;  %p2111_p11 = scmp.eq.s32.totalorder %s1711_s22, 0 }
  0x7f   : > { %1624 = dma.done.wait (%p2111_p11), [#allocation6], 2048   ;;  %p2112_p8 = pmov %p2111_p11 }
  0x81   : > { %1626 = vsyncadd (%p2112_p8), [#allocation6], 4294965248  ;;  %p2113_p13 = pmov %p2112_p8 }
  0x82   : > { %p2114_p6 = pmov %p2112_p8 }
  0x83   : > { %1628 = dma.done.wait (%p2113_p13), [#allocation9], 1024  }
  0x84   : > { %1630 = vsyncadd (%p2114_p6), [#allocation9], 4294966272  ;;  %v1427_v0 = vld [vmem:[#allocation5] sm:$0xff]   ;;  %v1428_v1 = vld [vmem:[#allocation5 + $0x8] sm:$0xff]   ;;  %s1345_s15 = smul.u32 160, %s1895_s17 }
  0x85   : > { %1219 = vmatprep.subr.bf16.mxu0 %v1427_v0  ;;  %v1429_v2 = vld [vmem:[#allocation5 + $0x10] sm:$0xff]   ;;  %v1430_v3 = vld [vmem:[#allocation5 + $0x18] sm:$0xff]   ;;  %v1431_v5 = vld [vmem:[#allocation5 + $0x20] sm:$0xff]   ;;  %s1164_s8 = smul.u32 2560, %s1711_s22  ;;  %s997_s22 = scalar_lea.sflag [#allocation4], %s1895_s17 }
  0x86   : > { %1220 = vmatpush3.bf16.msra.mxu0 %v1427_v0  ;;  %v1435_v4 = vld [vmem:[%s1899_s13] sm:$0xff]   ;;  %v1432_v6 = vld [vmem:[#allocation5 + $0x28] sm:$0xff]   ;;  %v1434_v11 = vld [vmem:[#allocation5 + $0x38] sm:$0xff]   ;;  %s1999_s9 = scalar_lea.vmem [#allocation10], %s1345_s15 }
  0x87   : > { %1221 = vmatprep.subr.bf16.mxu0 %v1428_v1  ;;  %1235 = vmatprep.mubr.bf16.mxu0 %v1435_v4  ;;  %v1445_v7 = vld [vmem:[#allocation7] sm:$0xff]   ;;  %v1446_v8 = vld [vmem:[#allocation7 + $0x8] sm:$0xff]   ;;  %v1433_v9 = vld [vmem:[#allocation5 + $0x30] sm:$0xff]   ;;  %s1010_s16 = sshll.u32 %s1999_s9, 4  ;;  %s2040_s10 = scalar_lea.hbm %s2095_s5, %s1164_s8  ;;  %s2042_s16 = int_to_ptr.vmem [resolvable:$true] %s1010_s16 }
  0x88   : > { %1255 = vmatprep.subr.bf16.mxu1 %v1445_v7  ;;  %v1447_v10 = vld [vmem:[#allocation7 + $0x10] sm:$0xff]   ;;  %v1448_v12 = vld [vmem:[#allocation7 + $0x18] sm:$0xff]   ;;  %v1449_v14 = vld [vmem:[#allocation7 + $0x20] sm:$0xff]   ;;  %s1575_s12 = scalar_lea.vmem %s2042_s16, 2560 }
  0x89   : > { %1256 = vmatpush3.bf16.msra.mxu1 %v1445_v7  ;;  %v1436_v13 = vld [vmem:[%s1899_s13 + $0x8] sm:$0xff]   ;;  %v1437_v15 = vld [vmem:[%s1899_s13 + $0x10] sm:$0xff]   ;;  %v1438_v17 = vld [vmem:[%s1899_s13 + $0x18] sm:$0xff]   ;;  %p1576_p10 = scmp.ne.s32.totalorder %s2042_s16, %s1575_s12 }
  0x8a   : > { %1222 = vmatpush3.bf16.msra.mxu0 %v1428_v1  ;;  %1257 = vmatprep.subr.bf16.mxu1 %v1446_v8  ;;  %v1450_v16 = vld [vmem:[#allocation7 + $0x28] sm:$0xff]   ;;  %v1439_v18 = vld [vmem:[%s1899_s13 + $0x20] sm:$0xff]   ;;  %v1441_v20 = vld [vmem:[%s1899_s13 + $0x30] sm:$0xff]  }
  0x8b   : > { %1223 = vmatprep.subr.bf16.mxu0 %v1429_v2  ;;  %v1440_v19 = vld [vmem:[%s1899_s13 + $0x28] sm:$0xff]   ;;  %v1442_v21 = vld [vmem:[%s1899_s13 + $0x38] sm:$0xff]   ;;  %v1443_v22 = vld [vmem:[%s1899_s13 + $0x40] sm:$0xff]   ;;  %p1577_p3 = pnand %p1576_p10, %p1844_p5 }
  0x8c   : > { %v1444_v23 = vld [vmem:[%s1899_s13 + $0x48] sm:$0xff]   ;;  %v1451_v24 = vld [vmem:[#allocation7 + $0x30] sm:$0xff]   ;;  %v1453_v26 = vld [vmem:[#allocation8] sm:$0xff]   ;;  %s1657_s13 = smov [#allocation10]  }
  0x8d   : > { %1258 = vmatpush3.bf16.msra.mxu1 %v1446_v8  ;;  %v1452_v25 = vld [vmem:[#allocation7 + $0x38] sm:$0xff]   ;;  %v1454_v27 = vld [vmem:[#allocation8 + $0x8] sm:$0xff]   ;;  %v1455_v28 = vld [vmem:[#allocation8 + $0x10] sm:$0xff]   ;;  %p1578_p7 = pneg %p1577_p3  ;;  %s1579_s24 = sshll.u32 %s1657_s13, 4  ;;  %s1580_s24 = int_to_ptr.vmem [resolvable:$false] %s1579_s24 }
  0x8e   : > { %1224 = vmatpush3.bf16.msra.mxu0 %v1429_v2  ;;  %1259 = vmatprep.subr.bf16.mxu1 %v1447_v10  ;;  %v1923_v29 = vld [vmem:[#allocation8 + $0x18] sm:$0xff]   ;;  %v1926_v30 = vld [vmem:[#allocation8 + $0x20] sm:$0xff]   ;;  %v1930_v31 = vld [vmem:[#allocation8 + $0x28] sm:$0xff]   ;;  %s1581_s26 = scalar_lea.vmem %s1580_s24, 5120  ;;  %p1582_p12 = scmp.lt.s32.totalorder %s2042_s16, %s1580_s24 }
  0x8f   : > { %1225 = vmatprep.subr.bf16.mxu0 %v1430_v3  ;;  %v1938_v32 = vld [vmem:[%s2094_s4] ss:$0 sm:$0xff]  ;;  %p1583_p1 = scmp.lt.s32.totalorder %s1581_s26, %s1575_s12 }
  0x91   : > { %1260 = vmatpush3.bf16.msra.mxu1 %v1447_v10  ;;  %p1584_p2 = por %p1583_p1, %p1582_p12 }
  0x92   : > { %1226 = vmatpush3.bf16.msra.mxu0 %v1430_v3  ;;  %1261 = vmatprep.subr.bf16.mxu1 %v1448_v12 }
  0x93   : > { %1227 = vmatprep.subr.bf16.mxu0 %v1431_v5  ;;  %p1585_p4 = pnand %p1584_p2, %p1578_p7 }
  0x95   : > { %1262 = vmatpush3.bf16.msra.mxu1 %v1448_v12 }
  0x96   : > { %1228 = vmatpush3.bf16.msra.mxu0 %v1431_v5  ;;  %1263 = vmatprep.subr.bf16.mxu1 %v1449_v14 }
  0x97   : > { %1229 = vmatprep.subr.bf16.mxu0 %v1432_v6 }
  0x99   : > { %1264 = vmatpush3.bf16.msra.mxu1 %v1449_v14 }
  0x9a   : > { %1230 = vmatpush3.bf16.msra.mxu0 %v1432_v6  ;;  %1265 = vmatprep.subr.bf16.mxu1 %v1450_v16 }
  0x9b   : > { %1231 = vmatprep.subr.bf16.mxu0 %v1433_v9 }
  0x9d   : > { %1266 = vmatpush3.bf16.msra.mxu1 %v1450_v16 }
  0x9e   : > { %1232 = vmatpush3.bf16.msra.mxu0 %v1433_v9  ;;  %1267 = vmatprep.subr.bf16.mxu1 %v1451_v24 }
  0x9f   : > { %1233 = vmatprep.subr.bf16.mxu0 %v1434_v11 }
  0xa1   : > { %1268 = vmatpush3.bf16.msra.mxu1 %v1451_v24 }
  0xa2   : > { %1234 = vmatpush3.bf16.msra.mxu0 %v1434_v11  ;;  %1269 = vmatprep.subr.bf16.mxu1 %v1452_v25 }
  0xa3   : > { %1291 = vmatprep.subr.bf16.mxu0 %v1453_v26 }
  0xa5   : > { %1236 = vmatmul.mubr.bf16.vlgmr.msra.gmra.mrb[0].mxu0 %v1436_v13  ;;  %1270 = vmatpush3.bf16.msra.mxu1 %v1452_v25 }
  0xa6   : > { %1239 = vmatprep.mubr.bf16.mxu0 %v1437_v15  ;;  %1327 = vmatprep.subr.bf16.mxu1 %v1453_v26 }
  0xa7   : > { %1292 = vmatpush3.bf16.msra.mxu0 %v1453_v26 }
  0xa8   : > { %1293 = vmatprep.subr.bf16.mxu0 %v1454_v27 }
  0xab   : > { %1294 = vmatpush3.bf16.msra.mxu0 %v1454_v27 }
  0xac   : > { %1295 = vmatprep.subr.bf16.mxu0 %v1455_v28 }
  0xad   : > { %1240 = vmatmul.mubr.bf16.gmra.mrb[4].mxu0 %v1438_v17 }
  0xae   : > { %1243 = vmatprep.mubr.bf16.mxu0 %v1439_v18 }
  0xaf   : > { %1296 = vmatpush3.bf16.msra.mxu0 %v1455_v28 }
  0xb0   : > { %1297 = vmatprep.subr.bf16.mxu0 %v1923_v29 }
  0xb3   : > { %1298 = vmatpush3.bf16.msra.mxu0 %v1923_v29 }
  0xb4   : > { %1299 = vmatprep.subr.bf16.mxu0 %v1926_v30 }
  0xb5   : > { %1244 = vmatmul.mubr.bf16.gmra.mrb[8].mxu0 %v1440_v19 }
  0xb6   : > { %1247 = vmatprep.mubr.bf16.mxu0 %v1441_v20 }
  0xb7   : > { %1300 = vmatpush3.bf16.msra.mxu0 %v1926_v30 }
  0xb8   : > { %1301 = vmatprep.subr.bf16.mxu0 %v1930_v31 }
  0xbb   : > { %1302 = vmatpush3.bf16.msra.mxu0 %v1930_v31 }
  0xbd   : > { %1248 = vmatmul.mubr.bf16.gmra.mrb[12].mxu0 %v1442_v21 }
  0xbe   : > { %1251 = vmatprep.mubr.bf16.mxu0 %v1443_v22 }
  0xc5   : > { %1252 = vmatmul.mubr.bf16.gmra.mrb[16].mxu0 %v1444_v23 }
 0x178   : > { %v1237_v33 = vpop.f32.mrb[0].mxu0 }
 0x179   : > { %v482_v34 = vadd.f32 %v1237_v33, %v1938_v32  ;;  %v473_v35 = vpop.f32.mrb[1].mxu0 }
 0x17a   : > { %v474_v36 = vadd.f32 %v1938_v32, %v473_v35  ;;  %v1238_v37 = vpop.f32.mrb[2].mxu0 }
 0x17b   : > { %v485_v38 = vadd.f32 %v1238_v37, %v1938_v32  ;;  %v476_v39 = vpop.f32.mrb[3].mxu0  ;;  %v554_v41 = vmax.f32 %v482_v34, 0.0 }
 0x17c   : > { %v477_v40 = vadd.f32 %v1938_v32, %v476_v39  ;;  %v552_v43 = vmax.f32 %v474_v36, 0.0 }
 0x17d   : > { %v555_v42 = vmax.f32 %v485_v38, 0.0 }
 0x17e   : > { %v553_v44 = vmax.f32 %v477_v40, 0.0 }
 0x17f   : > { %v573_v45 = vpack.c.bf16 %v555_v42, %v554_v41  ;;  %v1460_v41 = vld [vmem:[#allocation8 + $0x38] sm:$0xff]  }
 0x180   : > { %v1241_v46 = vpop.f32.mrb[4].mxu0  ;;  %v572_v47 = vpack.c.bf16 %v553_v44, %v552_v43 }
 0x181   : > { %v498_v48 = vadd.f32 %v1241_v46, %v1938_v32  ;;  %v489_v49 = vpop.f32.mrb[5].mxu0 }
 0x182   : > { %v490_v50 = vadd.f32 %v1938_v32, %v489_v49  ;;  %v1242_v51 = vpop.f32.mrb[6].mxu0  ;;  %1271 = vmatprep.mubr.bf16.mxu1 %v572_v47 }
 0x183   : > { %v501_v52 = vadd.f32 %v1242_v51, %v1938_v32  ;;  %v492_v53 = vpop.f32.mrb[7].mxu0  ;;  %1272 = vmatmul.mubr.bf16.vlgmr.msra.gmra.mrb[0].mxu1 %v573_v45  ;;  %v558_v55 = vmax.f32 %v498_v48, 0.0 }
 0x184   : > { %v493_v54 = vadd.f32 %v1938_v32, %v492_v53  ;;  %1335 = vmatpush3.bf16.msra.mxu1 %v1453_v26  ;;  %v556_v57 = vmax.f32 %v490_v50, 0.0 }
 0x185   : > { %v559_v56 = vmax.f32 %v501_v52, 0.0  ;;  %1328 = vmatprep.subr.bf16.mxu1 %v1454_v27 }
 0x186   : > { %v557_v58 = vmax.f32 %v493_v54, 0.0 }
 0x187   : > { %v575_v59 = vpack.c.bf16 %v559_v56, %v558_v55 }
 0x188   : > { %v574_v60 = vpack.c.bf16 %v557_v58, %v556_v57  ;;  %v1245_v61 = vpop.f32.mrb[8].mxu0  ;;  %1336 = vmatpush3.bf16.msra.mxu1 %v1454_v27 }
 0x189   : > { %v514_v62 = vadd.f32 %v1245_v61, %v1938_v32  ;;  %v505_v63 = vpop.f32.mrb[9].mxu0  ;;  %1329 = vmatprep.subr.bf16.mxu1 %v1455_v28 }
 0x18a   : > { %v506_v0 = vadd.f32 %v1938_v32, %v505_v63  ;;  %v1246_v1 = vpop.f32.mrb[10].mxu0  ;;  %1275 = vmatprep.mubr.bf16.mxu1 %v574_v60 }
 0x18b   : > { %v517_v2 = vadd.f32 %v1246_v1, %v1938_v32  ;;  %v508_v3 = vpop.f32.mrb[11].mxu0  ;;  %1276 = vmatmul.mubr.bf16.gmra.mrb[4].mxu1 %v575_v59  ;;  %v562_v5 = vmax.f32 %v514_v62, 0.0 }
 0x18c   : > { %v509_v4 = vadd.f32 %v1938_v32, %v508_v3  ;;  %1337 = vmatpush3.bf16.msra.mxu1 %v1455_v28  ;;  %v560_v7 = vmax.f32 %v506_v0, 0.0 }
 0x18d   : > { %v563_v6 = vmax.f32 %v517_v2, 0.0  ;;  %1330 = vmatprep.subr.bf16.mxu1 %v1923_v29 }
 0x18e   : > { %v561_v8 = vmax.f32 %v509_v4, 0.0 }
 0x18f   : > { %v577_v9 = vpack.c.bf16 %v563_v6, %v562_v5 }
 0x190   : > { %v576_v10 = vpack.c.bf16 %v561_v8, %v560_v7  ;;  %v1249_v11 = vpop.f32.mrb[12].mxu0  ;;  %1338 = vmatpush3.bf16.msra.mxu1 %v1923_v29 }
 0x191   : > { %v530_v12 = vadd.f32 %v1249_v11, %v1938_v32  ;;  %v521_v13 = vpop.f32.mrb[13].mxu0  ;;  %1331 = vmatprep.subr.bf16.mxu1 %v1926_v30 }
 0x192   : > { %v522_v14 = vadd.f32 %v1938_v32, %v521_v13  ;;  %v1250_v15 = vpop.f32.mrb[14].mxu0  ;;  %1279 = vmatprep.mubr.bf16.mxu1 %v576_v10 }
 0x193   : > { %v533_v16 = vadd.f32 %v1250_v15, %v1938_v32  ;;  %v524_v17 = vpop.f32.mrb[15].mxu0  ;;  %1280 = vmatmul.mubr.bf16.gmra.mrb[8].mxu1 %v577_v9  ;;  %v566_v19 = vmax.f32 %v530_v12, 0.0 }
 0x194   : > { %v525_v18 = vadd.f32 %v1938_v32, %v524_v17  ;;  %1339 = vmatpush3.bf16.msra.mxu1 %v1926_v30  ;;  %v564_v21 = vmax.f32 %v522_v14, 0.0 }
 0x195   : > { %v567_v20 = vmax.f32 %v533_v16, 0.0  ;;  %1332 = vmatprep.subr.bf16.mxu1 %v1930_v31 }
 0x196   : > { %v565_v22 = vmax.f32 %v525_v18, 0.0 }
 0x197   : > { %v579_v23 = vpack.c.bf16 %v567_v20, %v566_v19 }
 0x198   : > { %v578_v24 = vpack.c.bf16 %v565_v22, %v564_v21  ;;  %v1253_v25 = vpop.f32.mrb[16].mxu0  ;;  %1340 = vmatpush3.bf16.msra.mxu1 %v1930_v31  ;;  %v1459_v31 = vld [vmem:[#allocation8 + $0x30] sm:$0xff]  }
 0x199   : > { %v546_v26 = vadd.f32 %v1253_v25, %v1938_v32  ;;  %v537_v27 = vpop.f32.mrb[17].mxu0  ;;  %1303 = vmatprep.subr.bf16.mxu0 %v1459_v31  ;;  %1333 = vmatprep.subr.bf16.mxu1 %v1459_v31 }
 0x19a   : > { %v538_v28 = vadd.f32 %v1938_v32, %v537_v27  ;;  %v1254_v29 = vpop.f32.mrb[18].mxu0  ;;  %1283 = vmatprep.mubr.bf16.mxu1 %v578_v24  ;;  %1304 = vmatpush3.bf16.msra.mxu0 %v1459_v31 }
 0x19b   : > { %v549_v30 = vadd.f32 %v1254_v29, %v1938_v32  ;;  %v540_v33 = vpop.f32.mrb[19].mxu0  ;;  %1284 = vmatmul.mubr.bf16.gmra.mrb[12].mxu1 %v579_v23  ;;  %v570_v35 = vmax.f32 %v546_v26, 0.0  ;;  %1305 = vmatprep.subr.bf16.mxu0 %v1460_v41 }
 0x19c   : > { %v541_v34 = vadd.f32 %v1938_v32, %v540_v33  ;;  %v568_v37 = vmax.f32 %v538_v28, 0.0  ;;  %1341 = vmatpush3.bf16.msra.mxu1 %v1459_v31  ;;  %v1969_v32 = vld [vmem:[%s2094_s4 + $0x1] ss:$0 sm:$0xff] }
 0x19d   : > { %v571_v36 = vmax.f32 %v549_v30, 0.0  ;;  %1334 = vmatprep.subr.bf16.mxu1 %v1460_v41 }
 0x19e   : > { %v569_v38 = vmax.f32 %v541_v34, 0.0  ;;  %1306 = vmatpush3.bf16.msra.mxu0 %v1460_v41 }
 0x19f   : > { %v581_v39 = vpack.c.bf16 %v571_v36, %v570_v35 }
 0x1a0   : > { %v580_v40 = vpack.c.bf16 %v569_v38, %v568_v37  ;;  %1342 = vmatpush3.bf16.msra.mxu1 %v1460_v41 }
 0x1a2   : > { %1287 = vmatprep.mubr.bf16.mxu1 %v580_v40 }
 0x1a3   : > { %1288 = vmatmul.mubr.bf16.gmra.mrb[16].mxu1 %v581_v39 }
 0x256   : > { %v1273_v42 = vpop.f32.mrb[0].mxu1 }
 0x257   : > { %v694_v43 = vadd.f32 %v1273_v42, %v1969_v32  ;;  %v685_v44 = vpop.f32.mrb[1].mxu1 }
 0x258   : > { %v686_v45 = vadd.f32 %v1969_v32, %v685_v44  ;;  %v1274_v46 = vpop.f32.mrb[2].mxu1 }
 0x259   : > { %v697_v47 = vadd.f32 %v1274_v46, %v1969_v32  ;;  %v688_v48 = vpop.f32.mrb[3].mxu1  ;;  %v766_v50 = vmax.f32 %v694_v43, 0.0 }
 0x25a   : > { %v689_v49 = vadd.f32 %v1969_v32, %v688_v48  ;;  %v764_v52 = vmax.f32 %v686_v45, 0.0 }
 0x25b   : > { %v767_v51 = vmax.f32 %v697_v47, 0.0 }
 0x25c   : > { %v765_v53 = vmax.f32 %v689_v49, 0.0  ;;  %v1995_v49 = vld [vmem:[%s2094_s4 + $0x2] ss:$0 sm:$0xff] }
 0x25d   : > { %v785_v54 = vpack.c.bf16 %v767_v51, %v766_v50 }
 0x25e   : > { %v784_v55 = vpack.c.bf16 %v765_v53, %v764_v52  ;;  %v1277_v56 = vpop.f32.mrb[4].mxu1 }
 0x25f   : > { %v710_v57 = vadd.f32 %v1277_v56, %v1969_v32  ;;  %v701_v58 = vpop.f32.mrb[5].mxu1 }
 0x260   : > { %v702_v59 = vadd.f32 %v1969_v32, %v701_v58  ;;  %v1278_v60 = vpop.f32.mrb[6].mxu1  ;;  %1307 = vmatprep.mubr.bf16.mxu0 %v784_v55 }
 0x261   : > { %v713_v61 = vadd.f32 %v1278_v60, %v1969_v32  ;;  %v704_v62 = vpop.f32.mrb[7].mxu1  ;;  %1308 = vmatmul.mubr.bf16.vlgmr.msra.gmra.mrb[20].mxu0 %v785_v54  ;;  %v770_v0 = vmax.f32 %v710_v57, 0.0 }
 0x262   : > { %v705_v63 = vadd.f32 %v1969_v32, %v704_v62  ;;  %v768_v2 = vmax.f32 %v702_v59, 0.0 }
 0x263   : > { %v771_v1 = vmax.f32 %v713_v61, 0.0 }
 0x264   : > { %v769_v3 = vmax.f32 %v705_v63, 0.0 }
 0x265   : > { %v787_v4 = vpack.c.bf16 %v771_v1, %v770_v0 }
 0x266   : > { %v786_v5 = vpack.c.bf16 %v769_v3, %v768_v2  ;;  %v1281_v6 = vpop.f32.mrb[8].mxu1 }
 0x267   : > { %v726_v7 = vadd.f32 %v1281_v6, %v1969_v32  ;;  %v717_v8 = vpop.f32.mrb[9].mxu1 }
 0x268   : > { %v718_v9 = vadd.f32 %v1969_v32, %v717_v8  ;;  %v1282_v10 = vpop.f32.mrb[10].mxu1  ;;  %1311 = vmatprep.mubr.bf16.mxu0 %v786_v5 }
 0x269   : > { %v729_v11 = vadd.f32 %v1282_v10, %v1969_v32  ;;  %v720_v12 = vpop.f32.mrb[11].mxu1  ;;  %1312 = vmatmul.mubr.bf16.gmra.mrb[24].mxu0 %v787_v4  ;;  %v774_v14 = vmax.f32 %v726_v7, 0.0 }
 0x26a   : > { %v721_v13 = vadd.f32 %v1969_v32, %v720_v12  ;;  %v772_v16 = vmax.f32 %v718_v9, 0.0 }
 0x26b   : > { %v775_v15 = vmax.f32 %v729_v11, 0.0 }
 0x26c   : > { %v773_v17 = vmax.f32 %v721_v13, 0.0 }
 0x26d   : > { %v789_v18 = vpack.c.bf16 %v775_v15, %v774_v14 }
 0x26e   : > { %v788_v19 = vpack.c.bf16 %v773_v17, %v772_v16  ;;  %v1285_v20 = vpop.f32.mrb[12].mxu1 }
 0x26f   : > { %v742_v21 = vadd.f32 %v1285_v20, %v1969_v32  ;;  %v733_v22 = vpop.f32.mrb[13].mxu1 }
 0x270   : > { %v734_v23 = vadd.f32 %v1969_v32, %v733_v22  ;;  %v1286_v24 = vpop.f32.mrb[14].mxu1  ;;  %1315 = vmatprep.mubr.bf16.mxu0 %v788_v19 }
 0x271   : > { %v745_v25 = vadd.f32 %v1286_v24, %v1969_v32  ;;  %v736_v26 = vpop.f32.mrb[15].mxu1  ;;  %1316 = vmatmul.mubr.bf16.gmra.mrb[28].mxu0 %v789_v18  ;;  %v778_v28 = vmax.f32 %v742_v21, 0.0 }
 0x272   : > { %v737_v27 = vadd.f32 %v1969_v32, %v736_v26  ;;  %v776_v30 = vmax.f32 %v734_v23, 0.0 }
 0x273   : > { %v779_v29 = vmax.f32 %v745_v25, 0.0 }
 0x274   : > { %v777_v33 = vmax.f32 %v737_v27, 0.0 }
 0x275   : > { %v791_v34 = vpack.c.bf16 %v779_v29, %v778_v28 }
 0x276   : > { %v790_v35 = vpack.c.bf16 %v777_v33, %v776_v30  ;;  %v1289_v36 = vpop.f32.mrb[16].mxu1 }
 0x277   : > { %v758_v37 = vadd.f32 %v1289_v36, %v1969_v32  ;;  %v749_v38 = vpop.f32.mrb[17].mxu1 }
 0x278   : > { %v750_v39 = vadd.f32 %v1969_v32, %v749_v38  ;;  %v1290_v40 = vpop.f32.mrb[18].mxu1  ;;  %1319 = vmatprep.mubr.bf16.mxu1 %v790_v35 }
 0x279   : > { %v761_v31 = vadd.f32 %v1290_v40, %v1969_v32  ;;  %v752_v41 = vpop.f32.mrb[19].mxu1  ;;  %1320 = vmatmul.mubr.bf16.vlgmr.msra.gmra.mrb[20].mxu1 %v791_v34  ;;  %v782_v43 = vmax.f32 %v758_v37, 0.0 }
 0x27a   : > { %v753_v42 = vadd.f32 %v1969_v32, %v752_v41  ;;  %v780_v45 = vmax.f32 %v750_v39, 0.0 }
 0x27b   : > { %v783_v44 = vmax.f32 %v761_v31, 0.0 }
 0x27c   : > { %v781_v46 = vmax.f32 %v753_v42, 0.0 }
 0x27d   : > { %v793_v47 = vpack.c.bf16 %v783_v44, %v782_v43 }
 0x27e   : > { %v792_v48 = vpack.c.bf16 %v781_v46, %v780_v45 }
 0x280   : > { %1323 = vmatprep.mubr.bf16.mxu1 %v792_v48 }
 0x281   : > { %1324 = vmatmul.mubr.bf16.gmra.mrb[24].mxu1 %v793_v47 }
 0x334   : > { %v1309_v50 = vpop.f32.mrb[20].mxu0 }
 0x335   : > { %v906_v51 = vadd.f32 %v1309_v50, %v1995_v49  ;;  %v897_v52 = vpop.f32.mrb[21].mxu0 }
 0x336   : > { %v898_v32 = vadd.f32 %v1995_v49, %v897_v52  ;;  %v1310_v53 = vpop.f32.mrb[22].mxu0 }
 0x337   : > { %978 = vst [vmem:[%s1999_s9 + $0x10] sm:$0xff] %v906_v51  ;;  %v909_v54 = vadd.f32 %v1310_v53, %v1995_v49  ;;  %v900_v55 = vpop.f32.mrb[23].mxu0 }
 0x338   : > { %976 = vst [vmem:[%s1999_s9] sm:$0xff] %v898_v32  ;;  %v901_v56 = vadd.f32 %v1995_v49, %v900_v55 }
 0x339   : > { %979 = vst [vmem:[%s1999_s9 + $0x18] sm:$0xff] %v909_v54 }
 0x33a   : > { %977 = vst [vmem:[%s1999_s9 + $0x8] sm:$0xff] %v901_v56 }
 0x33c   : > { %v1313_v57 = vpop.f32.mrb[24].mxu0 }
 0x33d   : > { %v922_v58 = vadd.f32 %v1313_v57, %v1995_v49  ;;  %v913_v59 = vpop.f32.mrb[25].mxu0 }
 0x33e   : > { %v914_v60 = vadd.f32 %v1995_v49, %v913_v59  ;;  %v1314_v61 = vpop.f32.mrb[26].mxu0 }
 0x33f   : > { %982 = vst [vmem:[%s1999_s9 + $0x30] sm:$0xff] %v922_v58  ;;  %v925_v62 = vadd.f32 %v1314_v61, %v1995_v49  ;;  %v916_v63 = vpop.f32.mrb[27].mxu0 }
 0x340   : > { %980 = vst [vmem:[%s1999_s9 + $0x20] sm:$0xff] %v914_v60  ;;  %v917_v0 = vadd.f32 %v1995_v49, %v916_v63 }
 0x341   : > { %983 = vst [vmem:[%s1999_s9 + $0x38] sm:$0xff] %v925_v62 }
 0x342   : > { %981 = vst [vmem:[%s1999_s9 + $0x28] sm:$0xff] %v917_v0 }
 0x344   : > { %v1317_v1 = vpop.f32.mrb[28].mxu0 }
 0x345   : > { %v938_v2 = vadd.f32 %v1317_v1, %v1995_v49  ;;  %v929_v3 = vpop.f32.mrb[29].mxu0 }
 0x346   : > { %v930_v4 = vadd.f32 %v1995_v49, %v929_v3  ;;  %v1318_v5 = vpop.f32.mrb[30].mxu0 }
 0x347   : > { %986 = vst [vmem:[%s1999_s9 + $0x50] sm:$0xff] %v938_v2  ;;  %v941_v6 = vadd.f32 %v1318_v5, %v1995_v49  ;;  %v932_v7 = vpop.f32.mrb[31].mxu0 }
 0x348   : > { %984 = vst [vmem:[%s1999_s9 + $0x40] sm:$0xff] %v930_v4  ;;  %v933_v8 = vadd.f32 %v1995_v49, %v932_v7 }
 0x349   : > { %987 = vst [vmem:[%s1999_s9 + $0x58] sm:$0xff] %v941_v6 }
 0x34a   : > { %985 = vst [vmem:[%s1999_s9 + $0x48] sm:$0xff] %v933_v8 }
 0x34c   : > { %v1321_v9 = vpop.f32.mrb[20].mxu1 }
 0x34d   : > { %v954_v10 = vadd.f32 %v1321_v9, %v1995_v49  ;;  %v945_v11 = vpop.f32.mrb[21].mxu1 }
 0x34e   : > { %v946_v12 = vadd.f32 %v1995_v49, %v945_v11  ;;  %v1322_v13 = vpop.f32.mrb[22].mxu1 }
 0x34f   : > { %990 = vst [vmem:[%s1999_s9 + $0x70] sm:$0xff] %v954_v10  ;;  %v957_v14 = vadd.f32 %v1322_v13, %v1995_v49  ;;  %v948_v15 = vpop.f32.mrb[23].mxu1 }
 0x350   : > { %988 = vst [vmem:[%s1999_s9 + $0x60] sm:$0xff] %v946_v12  ;;  %v949_v16 = vadd.f32 %v1995_v49, %v948_v15 }
 0x351   : > { %991 = vst [vmem:[%s1999_s9 + $0x78] sm:$0xff] %v957_v14 }
 0x352   : > { %989 = vst [vmem:[%s1999_s9 + $0x68] sm:$0xff] %v949_v16 }
 0x354   : > { %v1325_v17 = vpop.f32.mrb[24].mxu1 }
 0x355   : > { %v970_v18 = vadd.f32 %v1325_v17, %v1995_v49  ;;  %v961_v19 = vpop.f32.mrb[25].mxu1 }
 0x356   : > { %v962_v20 = vadd.f32 %v1995_v49, %v961_v19  ;;  %v1326_v21 = vpop.f32.mrb[26].mxu1 }
 0x357   : > { %994 = vst [vmem:[%s1999_s9 + $0x90] sm:$0xff] %v970_v18  ;;  %v973_v22 = vadd.f32 %v1326_v21, %v1995_v49  ;;  %v964_v23 = vpop.f32.mrb[27].mxu1 }
 0x358   : > { %992 = vst [vmem:[%s1999_s9 + $0x80] sm:$0xff] %v962_v20  ;;  %v965_v24 = vadd.f32 %v1995_v49, %v964_v23 }
 0x359   : > { %995 = vst [vmem:[%s1999_s9 + $0x98] sm:$0xff] %v973_v22 }
 0x35a   : > { %993 = vst [vmem:[%s1999_s9 + $0x88] sm:$0xff] %v965_v24 }
 0x35b   : > { %1588 = shalt.err (!%p1585_p4)
}
 0x35c   : > { %s1589_s27 = scalar_lea.hbm %s2040_s10, 2560  ;;  %s1593_s6 = scalar_lea.hbm %s2095_s5, 5120 }
 0x35d   : > { %p1590_p9 = scmp.ne.s32.totalorder %s2040_s10, %s1589_s27  ;;  %p1594_p8 = scmp.lt.u32.totalorder %s2040_s10, %s2095_s5 }
 0x35e   : > { %p1595_p13 = scmp.lt.u32.totalorder %s1593_s6, %s1589_s27  ;;  %p1597_p10 = scmp.lt.u32.totalorder %s1589_s27, %s2040_s10 }
 0x35f   : > { %p1591_p0 = pnand %p1590_p9, %p1844_p5 }
 0x360   : > { %p1596_p6 = por %p1595_p13, %p1594_p8 }
 0x361   : > { %p1592_p11 = pneg %p1591_p0 }
 0x362   : > { %p1598_p3 = por %p1597_p10, %p1596_p6 }
 0x364   : > { %p1599_p7 = pnand %p1598_p3, %p1592_p11 }
 0x366   : > { %1602 = shalt.err (!%p1599_p7)
}
 0x367   : > { %s1658_s8 = smov 128   ;;  %s1659_s23 = smov 8  }
 0x368   : > { %1360 = dma.vmem_to_hbm [thread:$0]  (%p1844_p5), %s2042_s16, 2560, %s2040_s10, %s997_s22, %s1658_s8, %s1658_s8, %s1659_s23  }
 0x369 PF: > { %s1025_s29 = sand.u32 1, %s1637_s18   ;;  %p2115_p12 = scmp.ne.s32.totalorder %s2101_s25, 0 }
 0x36a   : > { %p2116_p1 = scmp.ge.s32.totalorder %s1649_s21, 2  ;;  %s1026_s12 = scalar_lea.sflag [#allocation4], %s1025_s29 }
 0x36c   : > { %p1377_p2 = pnand %p2116_p1, %p2115_p12 }
 0x36e   : > { %1632 = dma.done.wait (!%p1377_p2), %s1026_s12, 2560  }
 0x36f   : > { %1634 = vsyncadd (!%p1377_p2), %s1026_s12, 4294964736  ;;  %p20_p4 = scmp.ge.s32.totalorder %s1830_s14, 4   ;;  %s2117_s18 = smov %s1641_s19 }
 0x370   : > { %s2118_s19 = smov %s1645_s20  ;;  %s2119_s20 = smov %s1840_s30 }
 0x371   : > { %s2120_s21 = smov %s1830_s14  ;;  %22 = sbr.rel (!%p20_p4) target bundleno = 7 (0x7), region = 97 }
 0x378   :  { %1031 = vsyncpa [#allocation3], 1 }
 0x379   :  { %1033 = vsyncpa [#allocation3 + $0x1], 1 }
 0x37a   :  { %1034 = vsyncpa [#allocation6], 1 }
 0x37b   :  { %1035 = vsyncpa [#allocation9], 1 }
 0x37c   :  { %1036 = vsyncpa [#allocation4], 1 }
 0x37d   :  { %1038 = vsyncpa [#allocation4 + $0x1], 1 }

</bundles_post_ra>
